<compile_context>
chip_gen: v5e
topology: v5e:2x2
jax: 0.10.0
libtpu: 0.0.40
codegen_flags: <defaults>
</compile_context>

<pallas_src>
import functools

import jax
import jax.numpy as jnp
from jax.experimental import pallas as pl
from jax.experimental.pallas import tpu as pltpu


_MAX_TILE_BYTES = 4 << 20  # per-buffer tile cap; the tile-size curve is flat past ~4 MiB


def _vmem_capacity_bytes() -> int:
    try:
        return int(pltpu.get_tpu_info().vmem_capacity_bytes)
    except Exception:
        return 64 << 20  # conservative fallback (v7x per-TensorCore VMEM)


def _choose_block_rows(n_rows: int, n_cols: int, n_operands: int, itemsize: int) -> int:
    """Largest multiple-of-8 row tile that fits the (double-buffered) VMEM budget."""
    budget = _vmem_capacity_bytes() // 4                     # generous headroom
    per_buffer = min(budget // (2 * n_operands), _MAX_TILE_BYTES)
    rows = max(per_buffer // max(n_cols * itemsize, 1), 8)
    rows = (rows // 8) * 8
    if n_rows <= rows:
        return n_rows        # a single block equal to the full array dim is always legal
    return rows


# ----------------------------------------------------------------------------
# Kernels
# ----------------------------------------------------------------------------
def _softplus(x):
    # log(1 + exp(x)) = max(x, 0) + log(1 + exp(-|x|))   (overflow-safe, 2 EUP ops)
    return jnp.maximum(x, 0.0) + jnp.log(1.0 + jnp.exp(-jnp.abs(x)))


def _logistic_elemwise_kernel(sim_ref, tgt_ref, out_ref):
    """Elementwise logistic loss, no reduction ("none")."""
    x = -tgt_ref[...].astype(jnp.float32) * sim_ref[...].astype(jnp.float32)
    out_ref[...] = _softplus(x).astype(out_ref.dtype)


def _logistic_partial_kernel(sim_ref, tgt_ref, out_ref, *, n_rows, block_rows):
    """Per-grid-step partial sums written as a lane-dense (8, D) block."""
    i = pl.program_id(0)
    x = -tgt_ref[...].astype(jnp.float32) * sim_ref[...].astype(jnp.float32)
    loss = _softplus(x)
    d = loss.shape[-1]

    # Mask rows past the logical end (ragged final block of the cdiv grid).
    # Padded input rows hold undefined data; jnp.where selects 0.0 for them.
    row_ids = jax.lax.broadcasted_iota(jnp.int32, loss.shape, 0) + i * block_rows
    loss = jnp.where(row_ids < n_rows, loss, 0.0)

    if block_rows % 8 == 0:
        # Tile-aligned reshape (no data movement) + elementwise sums on the VPU;
        # the cross-lane/cross-sublane reduction is deferred to outside the kernel.
        partial = loss.reshape(block_rows // 8, 8, d).sum(axis=0)          # (8, d)
    else:
        # Single full-array block with N not a multiple of 8: one sublane reduction,
        # result placed in sublane 0 of the (8, d) output tile.
        col_sum = jnp.sum(loss, axis=0, keepdims=True)                     # (1, d)
        rid8 = jax.lax.broadcasted_iota(jnp.int32, (8, d), 0)
        partial = jnp.where(rid8 == 0, col_sum, 0.0)                       # (8, d)

    out_ref[...] = partial


# ----------------------------------------------------------------------------
# Module wrapper (mirrors fs_grl LogisticLoss)
# ----------------------------------------------------------------------------
class LogisticLoss:
    """JAX/Pallas port of fs_grl.modules.losses.log_loss.LogisticLoss."""

    def __init__(self, margin, reduction):
        # `margin` (and the module's ReLU) are stored but unused in forward,
        # exactly like the PyTorch module.
        self.margin = margin
        assert reduction in ("mean", "sum", "none")
        self.reduction = reduction

    def __call__(self, similarities, targets, *, block_rows=None):
        assert similarities.shape == targets.shape

        orig_shape = similarities.shape
        if similarities.ndim == 1:
            sim2 = similarities.reshape(1, -1)
            tgt2 = targets.reshape(1, -1)
        else:
            sim2 = similarities.reshape(-1, orig_shape[-1])
            tgt2 = targets.reshape(-1, orig_shape[-1])
        # TODO(synk): for very small last dims (< 128 lanes) a lane-dense repack of the
        # "none" output would avoid masked partial stores; not needed for these shapes.

        N, D = sim2.shape
        sim_isz = jnp.dtype(sim2.dtype).itemsize
        tgt_isz = jnp.dtype(tgt2.dtype).itemsize
        itemsize = max(sim_isz, tgt_isz)

        n_operands = 3 if self.reduction == "none" else 2   # reduce-path output is tiny
        if block_rows is None:
            block_rows = _choose_block_rows(N, D, n_operands, itemsize)
        grid = (pl.cdiv(N, block_rows),)

        in_spec = pl.BlockSpec((block_rows, D), lambda i: (i, 0))

        tile_bytes = block_rows * D * itemsize
        vmem_limit = int(min(_vmem_capacity_bytes() * 3 // 4,
                             max(32 << 20, 4 * n_operands * tile_bytes + (4 << 20))))
        compiler_params = pltpu.CompilerParams(
            dimension_semantics=("parallel",),
            vmem_limit_bytes=vmem_limit,
        )
        in_bytes = N * D * (sim_isz + tgt_isz)

        if self.reduction == "none":
            out = pl.pallas_call(
                _logistic_elemwise_kernel,
                out_shape=jax.ShapeDtypeStruct((N, D), sim2.dtype),
                grid_spec=pltpu.PrefetchScalarGridSpec(
                    num_scalar_prefetch=0,
                    grid=grid,
                    in_specs=[in_spec, in_spec],
                    out_specs=pl.BlockSpec((block_rows, D), lambda i: (i, 0)),
                ),
                compiler_params=compiler_params,
                cost_estimate=pl.CostEstimate(
                    flops=3 * N * D,
                    transcendentals=2 * N * D,
                    bytes_accessed=in_bytes + N * D * sim_isz,
                ),
            )(sim2, tgt2)
            return out.reshape(orig_shape)

        # "sum" / "mean": each grid step emits a lane-dense (8, D) partial-sum block;
        # the tiny cross-block reduction + scaling runs outside the kernel so the grid
        # stays fully parallel (both TensorCores on v7x).
        partials = pl.pallas_call(
            functools.partial(_logistic_partial_kernel, n_rows=N, block_rows=block_rows),
            out_shape=jax.ShapeDtypeStruct((grid[0] * 8, D), jnp.float32),
            grid_spec=pltpu.PrefetchScalarGridSpec(
                num_scalar_prefetch=0,
                grid=grid,
                in_specs=[in_spec, in_spec],
                out_specs=pl.BlockSpec((8, D), lambda i: (i, 0)),
            ),
            compiler_params=compiler_params,
            cost_estimate=pl.CostEstimate(
                flops=4 * N * D,
                transcendentals=2 * N * D,
                bytes_accessed=in_bytes + grid[0] * 8 * D * 4,
            ),
        )(sim2, tgt2)

        total = jnp.sum(partials)
        if self.reduction == "mean":
            total = total / jnp.float32(N * D)
        return total


# ----------------------------------------------------------------------------
# Demo / self-test
# ----------------------------------------------------------------------------
if __name__ == "__main__":
    key = jax.random.PRNGKey(0)
    k_sim, k_tgt = jax.random.split(key)

    # Small, deliberately ragged shape (N not a multiple of 8) to exercise masking.
    N, D = 30, 128
    similarities = jax.random.normal(k_sim, (N, D), dtype=jnp.float32)
    targets = jnp.where(
        jax.random.bernoulli(k_tgt, 0.5, (N, D)), 1.0, -1.0
    ).astype(jnp.float32)

    ref_elem = jnp.log(1.0 + jnp.exp(-targets * similarities))

    # mean (auto tile: single full-N block)
    loss_mean = LogisticLoss(margin=0.5, reduction="mean")(similarities, targets)
    jax.block_until_ready(loss_mean)
    assert jnp.allclose(loss_mean, jnp.mean(ref_elem), rtol=1e-5, atol=1e-5), (
        loss_mean, jnp.mean(ref_elem))

    # sum (forced small tile -> multi-block ragged grid, exercises the tail mask)
    loss_sum = LogisticLoss(margin=0.5, reduction="sum")(
        similarities, targets, block_rows=8)
    jax.block_until_ready(loss_sum)
    assert jnp.allclose(loss_sum, jnp.sum(ref_elem), rtol=1e-5, atol=1e-5), (
        loss_sum, jnp.sum(ref_elem))

    # none (forced small tile -> ragged elementwise writeback)
    loss_none = LogisticLoss(margin=0.5, reduction="none")(
        similarities, targets, block_rows=8)
    jax.block_until_ready(loss_none)
    assert jnp.allclose(loss_none, ref_elem, rtol=1e-5, atol=1e-5)

    print("KERNEL_OK")
</pallas_src>

<mosaic_0001>
module attributes {stable_mosaic.version = 11 : i64} {
  func.func @_logistic_partial_kernel(%arg0: i32, %arg1: memref<30x128xf32, #tpu.memory_space<vmem>>, %arg2: memref<30x128xf32, #tpu.memory_space<vmem>>, %arg3: memref<8x128xf32, #tpu.memory_space<vmem>>) attributes {dimension_semantics = [#tpu.dimension_semantics<parallel>], iteration_bounds = array<i64: 1>, scalar_prefetch = 0 : i64, scratch_operands = 0 : i64, tpu.core_type = #tpu.core_type<tc>, window_params = [{transform_indices = @transform_0, window_bounds = array<i64: 30, 128>}, {transform_indices = @transform_1, window_bounds = array<i64: 30, 128>}, {transform_indices = @transform_2, window_bounds = array<i64: 8, 128>}]} {
    %c0 = arith.constant 0 : index
    %c0_0 = arith.constant 0 : index
    %0 = vector.load %arg2[%c0, %c0_0] : memref<30x128xf32, #tpu.memory_space<vmem>>, vector<30x128xf32>
    %cst = arith.constant 0.000000e+00 : f32
    %1 = vector.broadcast %cst : f32 to vector<30x128xf32>
    %2 = arith.subf %1, %0 : vector<30x128xf32>
    %c0_1 = arith.constant 0 : index
    %c0_2 = arith.constant 0 : index
    %3 = vector.load %arg1[%c0_1, %c0_2] : memref<30x128xf32, #tpu.memory_space<vmem>>, vector<30x128xf32>
    %4 = arith.mulf %2, %3 : vector<30x128xf32>
    %cst_3 = arith.constant 0.000000e+00 : f32
    %5 = vector.broadcast %cst_3 : f32 to vector<30x128xf32>
    %6 = arith.maximumf %4, %5 : vector<30x128xf32>
    %7 = math.absf %4 : vector<30x128xf32>
    %cst_4 = arith.constant 0.000000e+00 : f32
    %8 = vector.broadcast %cst_4 : f32 to vector<30x128xf32>
    %9 = arith.subf %8, %7 : vector<30x128xf32>
    %10 = math.exp %9 : vector<30x128xf32>
    %cst_5 = arith.constant 1.000000e+00 : f32
    %11 = vector.broadcast %cst_5 : f32 to vector<30x128xf32>
    %12 = arith.addf %11, %10 : vector<30x128xf32>
    %13 = math.log %12 : vector<30x128xf32>
    %14 = arith.addf %6, %13 : vector<30x128xf32>
    %15 = tpu.iota {dimensions = array<i32: 0>} : vector<30x128xi32>
    %c30_i32 = arith.constant 30 : i32
    %16 = arith.muli %arg0, %c30_i32 : i32
    %17 = vector.broadcast %16 : i32 to vector<30x128xi32>
    %18 = arith.addi %15, %17 : vector<30x128xi32>
    %c30_i32_6 = arith.constant 30 : i32
    %19 = vector.broadcast %c30_i32_6 : i32 to vector<30x128xi32>
    %20 = arith.cmpi slt, %18, %19 : vector<30x128xi32>
    %cst_7 = arith.constant 0.000000e+00 : f32
    %21 = vector.broadcast %cst_7 : f32 to vector<30x128xf32>
    %22 = arith.select %20, %14, %21 : vector<30x128xi1>, vector<30x128xf32>
    %cst_8 = arith.constant dense<0.000000e+00> : vector<128xf32>
    %23 = vector.multi_reduction <add>, %22, %cst_8 [0] : vector<30x128xf32> to vector<128xf32>
    %24 = vector.shape_cast %23 : vector<128xf32> to vector<1x128xf32>
    %25 = tpu.iota {dimensions = array<i32: 0>} : vector<8x128xi32>
    %c0_i32 = arith.constant 0 : i32
    %26 = vector.broadcast %c0_i32 : i32 to vector<8x128xi32>
    %27 = arith.cmpi eq, %25, %26 : vector<8x128xi32>
    %cst_9 = arith.constant 0.000000e+00 : f32
    %28 = vector.shape_cast %24 : vector<1x128xf32> to vector<1x128xf32>
    %29 = vector.broadcast %28 : vector<1x128xf32> to vector<8x128xf32>
    %30 = vector.broadcast %cst_9 : f32 to vector<8x128xf32>
    %31 = arith.select %27, %29, %30 : vector<8x128xi1>, vector<8x128xf32>
    %c0_10 = arith.constant 0 : index
    %c0_11 = arith.constant 0 : index
    %32 = vector.load %arg3[%c0_10, %c0_11] : memref<8x128xf32, #tpu.memory_space<vmem>>, vector<8x128xf32>
    tpu.vector_store %arg3[%c0_10, %c0_11], %31 {strides = array<i32>} : memref<8x128xf32, #tpu.memory_space<vmem>>, vector<8x128xf32>,
    return
  }
  func.func @transform_0(%arg0: i32) -> (i32, i32) {
    %c0_i32 = arith.constant 0 : i32
    %c0_i32_0 = arith.constant 0 : i32
    return %arg0, %c0_i32 : i32, i32
  }
  func.func @transform_1(%arg0: i32) -> (i32, i32) {
    %c0_i32 = arith.constant 0 : i32
    %c0_i32_0 = arith.constant 0 : i32
    return %arg0, %c0_i32 : i32, i32
  }
  func.func @transform_2(%arg0: i32) -> (i32, i32) {
    %c0_i32 = arith.constant 0 : i32
    %c0_i32_0 = arith.constant 0 : i32
    return %arg0, %c0_i32 : i32, i32
  }
}

</mosaic_0001>

<bundles_post_ra>
// kernel: tpu_custom_call.1
= control target key start
LH: loop header
LB: loop body
LE: loop exit
PB: predicated region body
PF: predicated region fallthrough
CT: control target
= control target key end

     0   :  { %7 = vsyncpa [#allocation3], 0  ;;  %s275_s0 = inlined_call_operand.hbm [shape: f32[30,128], index: 0, kind: input, shape index: {}]   ;;  %s276_s1 = inlined_call_operand.hbm [shape: f32[30,128], index: 1, kind: input, shape index: {}]   ;;  %s277_s2 = inlined_call_operand.hbm [shape: f32[8,128], index: 2, kind: output, shape index: {}]  }
   0x1   :  { %8 = vsyncpa [#allocation6], 0 }
   0x2   :  { %9 = vsyncpa [#allocation4], 0  ;;  %s14_s11 = sshll.u32 %s275_s0, 4  ;;  %s246_s12 = smov [#allocation2]   ;;  %s15_s11 = int_to_ptr.hbm [resolvable:$true] %s14_s11 }
   0x3   :  { %s16_s13 = sshll.u32 %s246_s12, 4  ;;  %s27_s16 = sshll.u32 %s276_s1, 4  ;;  %s17_s13 = int_to_ptr.vmem [resolvable:$true] %s16_s13  ;;  %s28_s16 = int_to_ptr.hbm [resolvable:$true] %s27_s16 }
   0x4   :  { %s247_s17 = smov 128   ;;  %s248_s18 = smov 8  }
   0x5   :  { %22 = dma.hbm_to_vmem [thread:$0]  %s15_s11, 512, %s17_s13, [#allocation3], %s247_s17, %s247_s17, %s248_s18  }
   0x6   :  { %s249_s19 = smov [#allocation5]  }
   0x7   :  { %s29_s20 = sshll.u32 %s249_s19, 4  ;;  %s30_s20 = int_to_ptr.vmem [resolvable:$true] %s29_s20 }
   0x8   :  { %35 = dma.hbm_to_vmem [thread:$0]  %s28_s16, 512, %s30_s20, [#allocation6], %s247_s17, %s247_s17, %s248_s18  }
   0x9   :  { %240 = dma.done.wait [#allocation3], 512  }
   0xa   :  { %241 = vsyncadd [#allocation3], 4294966784 }
   0xb   :  { %242 = dma.done.wait [#allocation6], 512  }
   0xc   :  { %243 = vsyncadd [#allocation6], 4294966784  ;;  %v44_v0 = vld [vmem:[#allocation5] sm:$0xff]  ;;  %v45_v1 = vld [vmem:[#allocation5 + $0x8] sm:$0xff]  ;;  %v96_v33 = vlaneseq  ;;  %vm117_vm1 = vcmask 1045504   ;;  %s250_s0 = smov [#allocation7]  }
   0xd   :  { %v46_v2 = vld [vmem:[#allocation5 + $0x10] sm:$0xff]  ;;  %v47_v3 = vld [vmem:[#allocation5 + $0x18] sm:$0x3f]  ;;  %v48_v4 = vsub.f32 0.0, %v44_v0  ;;  %v49_v5 = vsub.f32 0.0, %v45_v1  ;;  %v52_v7 = vld [vmem:[#allocation2] sm:$0xff] }
   0xe   :  { %v50_v6 = vsub.f32 0.0, %v46_v2  ;;  %v51_v8 = vsub.f32 0.0, %v47_v3  ;;  %v53_v9 = vld [vmem:[#allocation2 + $0x8] sm:$0xff]  ;;  %v54_v10 = vld [vmem:[#allocation2 + $0x10] sm:$0xff]  ;;  %v55_v11 = vld [vmem:[#allocation2 + $0x18] sm:$0x3f] }
   0xf   :  { %v56_v12 = vmul.f32 %v52_v7, %v48_v4  ;;  %v57_v13 = vmul.f32 %v53_v9, %v49_v5  ;;  %v97_v37 = vshrl.u32 %v96_v33, 7  ;;  %s134_s1 = sshll.u32 %s250_s0, 4  ;;  %s136_s23 = sshll.u32 %s277_s2, 4  ;;  %s135_s1 = int_to_ptr.vmem [resolvable:$true] %s134_s1  ;;  %s137_s23 = int_to_ptr.hbm [resolvable:$true] %s136_s23 }
  0x10   :  { %v58_v14 = vmul.f32 %v54_v10, %v50_v6  ;;  %v59_v15 = vmul.f32 %v55_v11, %v51_v8 }
  0x11   :  { %v64_v16 = vand.u32 2147483647, %v56_v12  ;;  %v65_v17 = vand.u32 2147483647, %v57_v13  ;;  %v60_v38 = vmax.f32 %v56_v12, 0.0  ;;  %v61_v40 = vmax.f32 %v57_v13, 0.0 }
  0x12   :  { %v66_v18 = vand.u32 2147483647, %v58_v14  ;;  %v67_v19 = vand.u32 2147483647, %v59_v15  ;;  %v62_v42 = vmax.f32 %v58_v14, 0.0  ;;  %v100_v44 = vadd.s32 24, %v97_v37 }
  0x13   :  { %v68_v20 = vsub.f32 0.0, %v64_v16  ;;  %v69_v21 = vsub.f32 0.0, %v65_v17  ;;  %v63_v46 = vmax.f32 %v59_v15, 0.0  ;;  %vm126_vm2 = vcmp.eq.s32.totalorder %v97_v37, 0 }
  0x14   :  { %v70_v22 = vsub.f32 0.0, %v66_v18  ;;  %v71_v23 = vsub.f32 0.0, %v67_v19  ;;  %vm110_vm0 = vcmp.lt.s32.totalorder %v100_v44, 30 }
  0x15   :  { %v72_v24 = vmul.f32 1.442695, %v68_v20  ;;  %v74_v25 = vmul.f32 1.442695, %v69_v21 }
  0x16   :  { %v76_v26 = vmul.f32 1.442695, %v70_v22  ;;  %v78_v27 = vmul.f32 1.442695, %v71_v23 }
  0x17   :  { %152 = vpow2.f32 %v72_v24 }
  0x18   :  { %154 = vpow2.f32 %v74_v25 }
  0x19   :  { %156 = vpow2.f32 %v76_v26 }
  0x1a   :  { %158 = vpow2.f32 %v78_v27 }
  0x1d   :  { %v153_v28 = vpop.eup %152 }
  0x1e   :  { %v155_v29 = vpop.eup %154  ;;  %v80_v30 = vadd.f32 1.0, %v153_v28 }
  0x1f   :  { %v157_v31 = vpop.eup %156  ;;  %v81_v32 = vadd.f32 1.0, %v155_v29 }
  0x20   :  { %v159_v34 = vpop.eup %158  ;;  %v82_v35 = vadd.f32 1.0, %v157_v31  ;;  %160 = vlog2.f32 %v80_v30 }
  0x21   :  { %v83_v36 = vadd.f32 1.0, %v159_v34  ;;  %162 = vlog2.f32 %v81_v32 }
  0x22   :  { %164 = vlog2.f32 %v82_v35 }
  0x23   :  { %166 = vlog2.f32 %v83_v36 }
  0x26   :  { %v161_v39 = vpop.eup %160 }
  0x27   :  { %v163_v41 = vpop.eup %162  ;;  %v85_v43 = vmul.f32 0.6931472, %v161_v39 }
  0x28   :  { %v165_v45 = vpop.eup %164  ;;  %v87_v47 = vmul.f32 0.6931472, %v163_v41 }
  0x29   :  { %v167_v48 = vpop.eup %166  ;;  %v89_v49 = vmul.f32 0.6931472, %v165_v45  ;;  %v92_v50 = vadd.f32 %v85_v43, %v60_v38 }
  0x2a   :  { %v91_v51 = vmul.f32 0.6931472, %v167_v48  ;;  %v93_v52 = vadd.f32 %v87_v47, %v61_v40 }
  0x2b   :  { %v94_v53 = vadd.f32 %v89_v49, %v62_v42 }
  0x2c   :  { %v95_v54 = vadd.f32 %v91_v51, %v63_v46  ;;  %v115_v55 = vadd.f32 %v93_v52, %v92_v50 }
  0x2e   :  { %v114_v56 = vsel %vm110_vm0, %v95_v54, 0.0  ;;  %v116_v57 = vadd.f32 %v115_v55, %v94_v53 }
  0x2f   :  { %v118_v58 = vsel %vm117_vm1, %v114_v56, 0.0 }
  0x30   :  { %v119_v59 = vadd.f32 %v118_v58, %v116_v57 }
  0x32   :  { %v120_v60 = vrot.slane %v119_v59, 4 }
  0x34   :  { %v121_v61 = vadd.f32 %v120_v60, %v119_v59 }
  0x36   :  { %v122_v62 = vrot.slane %v121_v61, 2 }
  0x38   :  { %v123_v63 = vadd.f32 %v122_v62, %v121_v61 }
  0x3a   :  { %v124_v0 = vrot.slane %v123_v63, 1 }
  0x3c   :  { %v125_v1 = vadd.f32 %v124_v0, %v123_v63 }
  0x3e   :  { %v127_v2 = vsel %vm126_vm2, %v125_v1, 0.0 }
  0x3f   :  { %128 = vst [vmem:[#allocation7] sm:$0xff] %v127_v2 }
  0x40   :  { %139 = dma.vmem_to_hbm [thread:$0]  %s135_s1, 128, %s137_s23, [#allocation4]  }
  0x41   :  { %244 = dma.done.wait [#allocation4], 128  }
  0x42   :  { %245 = vsyncadd [#allocation4], 4294967168 }
  0x43   :  { %144 = vsyncpa [#allocation3], 1 }
  0x44   :  { %145 = vsyncpa [#allocation6], 1 }
  0x45   :  { %146 = vsyncpa [#allocation4], 1 }

</bundles_post_ra>
